<compile_context>
chip_gen: v7x
topology: tpu7x:2x2x1
jax: 0.10.0
libtpu: 0.0.40
codegen_flags: <defaults>
</compile_context>

<pallas_src>
import functools
from typing import NamedTuple

import jax
import jax.numpy as jnp
from jax.experimental import pallas as pl
from jax.experimental.pallas import tpu as pltpu


def _round_up(x, m):
    return (x + m - 1) // m * m


def _vmem_capacity_bytes():
    """Physical VMEM per TensorCore, with a conservative fallback."""
    try:
        return int(pltpu.get_tpu_info().vmem_capacity_bytes)
    except Exception:
        return 64 * 1024 * 1024  # v7x-sized fallback (safe everywhere)


def _num_tensorcores():
    """Best-effort TensorCore count per chip (v7x: 2, v5e/v6e: 1)."""
    try:
        d = jax.devices()[0]
        n = getattr(d, "num_cores", None)
        if n:
            return int(n)
        kind = str(getattr(d, "device_kind", ""))
        return 2 if "7" in kind else 1
    except Exception:
        return 1


class QSiluWeights(NamedTuple):
    """Preprocessed weights — build once (prepare_qsilu_weights) and reuse."""
    wgu: jax.Array     # (H, nk * 2 * tk)  per-chunk interleaved [gate_k | up_k]
    wd: jax.Array      # (I_pad, H)        down_proj, padded rows are zero
    tk: int            # intermediate-dim chunk (multiple of 128)
    hidden: int        # H
    inter: int         # un-padded I


def prepare_qsilu_weights(w_gate, w_up, w_down, *, tk=512,
                          compute_dtype=jnp.bfloat16):
    """Cast to the MXU compute dtype, pad I to a multiple of tk and interleave
    gate/up per I-chunk. Do this ONCE per model (cache the result); doing it
    per forward call costs a full read+write pass over all MLP weights."""
    H, I = w_gate.shape
    tk = min(_round_up(tk, 128), _round_up(I, 128))
    I_pad = _round_up(I, tk)
    nk = I_pad // tk

    wg = w_gate.astype(compute_dtype)
    wu = w_up.astype(compute_dtype)
    wd = w_down.astype(compute_dtype)
    if I_pad != I:
        wg = jnp.pad(wg, ((0, 0), (0, I_pad - I)))
        wu = jnp.pad(wu, ((0, 0), (0, I_pad - I)))
        wd = jnp.pad(wd, ((0, I_pad - I), (0, 0)))

    # Per-chunk interleave [gate_k | up_k] so one BlockSpec block of width
    # 2*tk covers both projections for chunk k.
    wgu = jnp.concatenate(
        [wg.reshape(H, nk, tk), wu.reshape(H, nk, tk)], axis=2
    ).reshape(H, nk * 2 * tk)

    return QSiluWeights(wgu=wgu, wd=wd, tk=tk, hidden=H, inter=I)


def _qsilu_kernel(x_ref, g_ref, wgu_ref, wd_ref, o_ref, xn_ref, acc_ref,
                  *, eps, tk):
    # x_ref  : (tm, H)      token tile (input dtype)
    # g_ref  : (1, H)       RMSNorm scale
    # wgu_ref: (H, 2*tk)    [gate_k | up_k] fused weight slice (compute dtype)
    # wd_ref : (tk, H)      down_proj slice (compute dtype)
    # o_ref  : (tm, H)      output tile
    # xn_ref : (tm, H)      normalized-activation cache (compute dtype) scratch
    # acc_ref: (tm, H)      fp32 accumulator scratch
    k = pl.program_id(1)
    nk = pl.num_programs(1)

    @pl.when(k == 0)
    def _():
        # RMSNorm in fp32, single cast to the MXU compute dtype.
        x = x_ref[...].astype(jnp.float32)
        var = jnp.mean(x * x, axis=-1, keepdims=True)
        xn = x * jax.lax.rsqrt(var + eps) * g_ref[...].astype(jnp.float32)
        xn_ref[...] = xn.astype(xn_ref.dtype)
        acc_ref[...] = jnp.zeros_like(acc_ref)

    xn = xn_ref[...]
    # Fused gate/up projection for this I-chunk: (tm, 2*tk), fp32 accumulation.
    gu = jnp.dot(xn, wgu_ref[...], preferred_element_type=jnp.float32)
    gate = gu[:, :tk]
    up = gu[:, tk:]
    h = (gate * jax.nn.sigmoid(gate) * up).astype(wd_ref.dtype)  # SiLU(g)*u
    acc_ref[...] += jnp.dot(h, wd_ref[...], preferred_element_type=jnp.float32)

    @pl.when(k == nk - 1)
    def _():
        o_ref[...] = acc_ref[...].astype(o_ref.dtype)


def qsilu_net_prepared(x, g, weights: QSiluWeights, *, eps=1e-6, tm=512,
                       out_dtype=None):
    """Hot-path entry: x (B, S, H), g (H,), preprocessed weights.

    tm: requested token tile (auto-shrunk to fit the per-chip VMEM budget and
    split in two on multi-TensorCore chips so both cores get work).
    """
    B, S, H = x.shape
    assert H == weights.hidden, "hidden size mismatch with prepared weights"
    tk = weights.tk
    I_pad = weights.wd.shape[0]
    nk = I_pad // tk
    T = B * S
    out_dtype = out_dtype if out_dtype is not None else x.dtype
    compute_dtype = weights.wgu.dtype

    itm_x = x.dtype.itemsize
    itm_o = jnp.dtype(out_dtype).itemsize
    itm_c = jnp.dtype(compute_dtype).itemsize

    def vmem_est(tm_):
        # Double-buffered pipelined operands + persistent scratch + in-kernel
        # fp32 temporaries (gu, gate/up slices, h).
        return int(
            2 * tm_ * H * itm_x            # x tiles
            + 2 * H * 4                    # rms weight (tiny)
            + 2 * H * 2 * tk * itm_c       # wgu slices
            + 2 * tk * H * itm_c           # wd slices
            + 2 * tm_ * H * itm_o          # out tiles
            + tm_ * H * itm_c              # xn scratch
            + tm_ * H * 4                  # fp32 accumulator
            + tm_ * 2 * tk * 4             # gu (fp32)
            + 2 * tm_ * tk * 4             # gate / up slices (fp32)
            + tm_ * tk * itm_c)            # h (compute dtype)

    cap = _vmem_capacity_bytes()
    budget = int(cap * 0.8)                # headroom for Mosaic internals

    # --- token-tile selection -------------------------------------------
    tm = min(tm, _round_up(T, 8))
    # Multi-core chips (v7x): only the "parallel" token axis distributes work
    # across TensorCores, so make sure there are >= 2 token tiles.
    if _num_tensorcores() >= 2 and _round_up(T, tm) // tm < 2 and T >= 16:
        tm = _round_up(max(8, _round_up(T, 8) // 2), 8)
    # Shrink until the per-step footprint fits the per-chip VMEM budget.
    while vmem_est(tm) > budget and tm > 8:
        tm = max(8, _round_up(tm // 2, 8))

    T_pad = _round_up(T, tm)
    n_tiles = T_pad // tm

    x2d = x.reshape(T, H)
    if T_pad != T:
        x2d = jnp.pad(x2d, ((0, T_pad - T), (0, 0)))
    g2d = g.reshape(1, H)

    est = vmem_est(tm)
    vmem_limit = int(min(max(int(est * 1.2), 32 * 1024 * 1024), budget))

    # Advisory cost for XLA's scheduler around the custom call.
    flops = 6 * T_pad * H * I_pad + 4 * T_pad * H
    transcendentals = T_pad * I_pad + T_pad
    bytes_accessed = (x2d.size * itm_x
                      + T_pad * H * itm_o
                      + H * 4
                      + n_tiles * (weights.wgu.size + weights.wd.size) * itm_c)
    cost = pl.CostEstimate(flops=int(flops),
                           transcendentals=int(transcendentals),
                           bytes_accessed=int(bytes_accessed))

    out = pl.pallas_call(
        functools.partial(_qsilu_kernel, eps=eps, tk=tk),
        out_shape=jax.ShapeDtypeStruct((T_pad, H), out_dtype),
        grid_spec=pltpu.PrefetchScalarGridSpec(
            num_scalar_prefetch=0,
            grid=(n_tiles, nk),                            # I-axis innermost
            in_specs=[
                pl.BlockSpec((tm, H), lambda i, k: (i, 0)),      # x tile
                pl.BlockSpec((1, H), lambda i, k: (0, 0)),       # rms weight
                pl.BlockSpec((H, 2 * tk), lambda i, k: (0, k)),  # gate|up
                pl.BlockSpec((tk, H), lambda i, k: (k, 0)),      # down slice
            ],
            out_specs=pl.BlockSpec((tm, H), lambda i, k: (i, 0)),
            scratch_shapes=[
                pltpu.VMEM((tm, H), compute_dtype),   # cached rmsnorm(x)
                pltpu.VMEM((tm, H), jnp.float32),     # down_proj accumulator
            ],
        ),
        compiler_params=pltpu.CompilerParams(
            dimension_semantics=("parallel", "arbitrary"),
            vmem_limit_bytes=vmem_limit,
        ),
        cost_estimate=cost,
    )(x2d, g2d, weights.wgu, weights.wd)

    return out[:T].reshape(B, S, H)


def qsilu_net(x, g, w_gate, w_up, w_down, *, eps=1e-6, tm=512, tk=512,
              compute_dtype=jnp.bfloat16, out_dtype=None):
    """Convenience wrapper: preprocess weights then run the fused kernel.
    In a real model, call prepare_qsilu_weights() once and reuse the result
    with qsilu_net_prepared() to keep weight preprocessing off the hot path."""
    weights = prepare_qsilu_weights(w_gate, w_up, w_down, tk=tk,
                                    compute_dtype=compute_dtype)
    return qsilu_net_prepared(x, g, weights, eps=eps, tm=tm,
                              out_dtype=out_dtype)


def _reference(x, g, w_gate, w_up, w_down, eps=1e-6):
    xf = x.astype(jnp.float32)
    var = jnp.mean(xf * xf, axis=-1, keepdims=True)
    xn = (xf * jax.lax.rsqrt(var + eps)) * g
    gate = xn @ w_gate
    up = xn @ w_up
    h = gate * jax.nn.sigmoid(gate) * up
    return (h @ w_down).astype(x.dtype)


def _check(out, ref, label):
    max_err = jnp.max(jnp.abs(out.astype(jnp.float32) - ref.astype(jnp.float32)))
    assert jnp.allclose(out.astype(jnp.float32), ref.astype(jnp.float32),
                        atol=2e-2, rtol=5e-2), (
        f"{label}: mismatch vs reference (max abs err {max_err})")


if __name__ == "__main__":
    key = jax.random.PRNGKey(0)

    # ---- Test 1: small Llama-style shapes, single I-chunk --------------
    batch, seq, hidden, inter = 2, 8, 256, 512
    kx, kg, ku, kd = jax.random.split(key, 4)
    x = jax.random.normal(kx, (batch, seq, hidden), dtype=jnp.float32)
    g = jnp.ones((hidden,), dtype=jnp.float32)   # RMSNorm weight = ones
    w_gate = jax.random.normal(kg, (hidden, inter), dtype=jnp.float32) * 0.02
    w_up = jax.random.normal(ku, (hidden, inter), dtype=jnp.float32) * 0.02
    w_down = jax.random.normal(kd, (inter, hidden), dtype=jnp.float32) * 0.02

    weights = prepare_qsilu_weights(w_gate, w_up, w_down)   # cache once
    out = qsilu_net_prepared(x, g, weights)
    jax.block_until_ready(out)
    assert out.shape == (batch, seq, hidden)
    _check(out, _reference(x, g, w_gate, w_up, w_down), "test1")

    # ---- Test 2: exercises nk>1 accumulation, I-padding, T-padding and
    # multiple token tiles (T=250 -> T_pad=256 with tm=128; I=384, tk=256
    # -> I_pad=512, nk=2) -------------------------------------------------
    batch2, seq2, hidden2, inter2 = 1, 250, 256, 384
    k2 = jax.random.split(jax.random.PRNGKey(1), 4)
    x2 = jax.random.normal(k2[0], (batch2, seq2, hidden2), dtype=jnp.float32)
    g2 = jax.random.normal(k2[1], (hidden2,), dtype=jnp.float32) * 0.1 + 1.0
    wg2 = jax.random.normal(k2[2], (hidden2, inter2), dtype=jnp.float32) * 0.02
    wu2 = jax.random.normal(k2[3], (hidden2, inter2), dtype=jnp.float32) * 0.02
    wd2 = jax.random.normal(k2[0], (inter2, hidden2), dtype=jnp.float32) * 0.02

    out2 = qsilu_net(x2, g2, wg2, wu2, wd2, tm=128, tk=256)
    jax.block_until_ready(out2)
    assert out2.shape == (batch2, seq2, hidden2)
    _check(out2, _reference(x2, g2, wg2, wu2, wd2), "test2")

    print("KERNEL_OK")
</pallas_src>

<mosaic_0001>
module attributes {stable_mosaic.version = 11 : i64} {
  func.func @_qsilu_kernel(%arg0: i32, %arg1: i32, %arg2: memref<16x256xf32, #tpu.memory_space<vmem>>, %arg3: memref<1x256xf32, #tpu.memory_space<vmem>>, %arg4: memref<256x1024xbf16, #tpu.memory_space<vmem>>, %arg5: memref<512x256xbf16, #tpu.memory_space<vmem>>, %arg6: memref<16x256xf32, #tpu.memory_space<vmem>>, %arg7: memref<16x256xbf16, #tpu.memory_space<vmem>>, %arg8: memref<16x256xf32, #tpu.memory_space<vmem>>) attributes {dimension_semantics = [#tpu.dimension_semantics<parallel>, #tpu.dimension_semantics<arbitrary>], iteration_bounds = array<i64: 1, 1>, scalar_prefetch = 0 : i64, scratch_operands = 2 : i64, tpu.core_type = #tpu.core_type<tc>, window_params = [{transform_indices = @transform_0, window_bounds = array<i64: 16, 256>}, {pipeline_mode = #tpu.pipeline_mode<synchronous>, transform_indices = @transform_1, window_bounds = array<i64: 1, 256>}, {transform_indices = @transform_2, window_bounds = array<i64: 256, 1024>}, {transform_indices = @transform_3, window_bounds = array<i64: 512, 256>}, {transform_indices = @transform_4, window_bounds = array<i64: 16, 256>}]} {
    %c0_i32 = arith.constant 0 : i32
    %0 = arith.cmpi eq, %arg1, %c0_i32 : i32
    %1 = arith.extui %0 : i1 to i32
    %c0_i32_0 = arith.constant 0 : i32
    %2 = arith.cmpi ne, %1, %c0_i32_0 : i32
    scf.if %2 {
      %c0_14 = arith.constant 0 : index
      %c0_15 = arith.constant 0 : index
      %24 = vector.load %arg2[%c0_14, %c0_15] : memref<16x256xf32, #tpu.memory_space<vmem>>, vector<16x256xf32>
      %25 = arith.mulf %24, %24 : vector<16x256xf32>
      %cst_16 = arith.constant dense<0.000000e+00> : vector<16xf32>
      %26 = vector.multi_reduction <add>, %25, %cst_16 [1] : vector<16x256xf32> to vector<16xf32>
      %27 = vector.shape_cast %26 : vector<16xf32> to vector<16x1xf32>
      %cst_17 = arith.constant 2.560000e+02 : f32
      %28 = vector.broadcast %cst_17 : f32 to vector<16x1xf32>
      %29 = arith.divf %27, %28 : vector<16x1xf32>
      %cst_18 = arith.constant 9.99999997E-7 : f32
      %30 = vector.broadcast %cst_18 : f32 to vector<16x1xf32>
      %31 = arith.addf %29, %30 : vector<16x1xf32>
      %32 = math.rsqrt %31 : vector<16x1xf32>
      %33 = vector.broadcast %32 : vector<16x1xf32> to vector<16x256xf32>
      %34 = arith.mulf %24, %33 : vector<16x256xf32>
      %c0_19 = arith.constant 0 : index
      %c0_20 = arith.constant 0 : index
      %35 = vector.load %arg3[%c0_19, %c0_20] : memref<1x256xf32, #tpu.memory_space<vmem>>, vector<1x256xf32>
      %36 = vector.broadcast %35 : vector<1x256xf32> to vector<16x256xf32>
      %37 = arith.mulf %34, %36 : vector<16x256xf32>
      %38 = arith.truncf %37 : vector<16x256xf32> to vector<16x256xbf16>
      %c0_21 = arith.constant 0 : index
      %c0_22 = arith.constant 0 : index
      %39 = vector.load %arg7[%c0_21, %c0_22] : memref<16x256xbf16, #tpu.memory_space<vmem>>, vector<16x256xbf16>
      tpu.vector_store %arg7[%c0_21, %c0_22], %38 {strides = array<i32>} : memref<16x256xbf16, #tpu.memory_space<vmem>>, vector<16x256xbf16>,
      %cst_23 = arith.constant 0.000000e+00 : f32
      %40 = vector.broadcast %cst_23 : f32 to vector<16x256xf32>
      %c0_24 = arith.constant 0 : index
      %c0_25 = arith.constant 0 : index
      %41 = vector.load %arg8[%c0_24, %c0_25] : memref<16x256xf32, #tpu.memory_space<vmem>>, vector<16x256xf32>
      tpu.vector_store %arg8[%c0_24, %c0_25], %40 {strides = array<i32>} : memref<16x256xf32, #tpu.memory_space<vmem>>, vector<16x256xf32>,
    } else {
    }
    %c0 = arith.constant 0 : index
    %c0_1 = arith.constant 0 : index
    %3 = vector.load %arg7[%c0, %c0_1] : memref<16x256xbf16, #tpu.memory_space<vmem>>, vector<16x256xbf16>
    %c0_2 = arith.constant 0 : index
    %c0_3 = arith.constant 0 : index
    %4 = vector.load %arg4[%c0_2, %c0_3] : memref<256x1024xbf16, #tpu.memory_space<vmem>>, vector<256x1024xbf16>
    %cst = arith.constant dense<0.000000e+00> : vector<16x1024xf32>
    %5 = tpu.matmul %3, %4, %cst {dimension_numbers = #tpu.dot_dimension_numbers<[1], [0], [0], [1], [0, 0, 1, 1], [], []>} : vector<16x256xbf16>, vector<256x1024xbf16>, vector<16x1024xf32> -> vector<16x1024xf32>
    %6 = vector.extract_strided_slice %5 {offsets = [0, 0], sizes = [16, 512], strides = [1, 1]} : vector<16x1024xf32> to vector<16x512xf32>
    %7 = vector.extract_strided_slice %5 {offsets = [0, 512], sizes = [16, 512], strides = [1, 1]} : vector<16x1024xf32> to vector<16x512xf32>
    %8 = arith.negf %6 : vector<16x512xf32>
    %9 = math.exp %8 : vector<16x512xf32>
    %cst_4 = arith.constant 1.000000e+00 : f32
    %10 = vector.broadcast %cst_4 : f32 to vector<16x512xf32>
    %11 = arith.addf %10, %9 : vector<16x512xf32>
    %12 = arith.divf %10, %11 : vector<16x512xf32>
    %13 = arith.mulf %6, %12 : vector<16x512xf32>
    %14 = arith.mulf %13, %7 : vector<16x512xf32>
    %15 = arith.truncf %14 : vector<16x512xf32> to vector<16x512xbf16>
    %c0_5 = arith.constant 0 : index
    %c0_6 = arith.constant 0 : index
    %16 = vector.load %arg8[%c0_5, %c0_6] : memref<16x256xf32, #tpu.memory_space<vmem>>, vector<16x256xf32>
    %c0_7 = arith.constant 0 : index
    %c0_8 = arith.constant 0 : index
    %17 = vector.load %arg5[%c0_7, %c0_8] : memref<512x256xbf16, #tpu.memory_space<vmem>>, vector<512x256xbf16>
    %cst_9 = arith.constant dense<0.000000e+00> : vector<16x256xf32>
    %18 = tpu.matmul %15, %17, %cst_9 {dimension_numbers = #tpu.dot_dimension_numbers<[1], [0], [0], [1], [0, 0, 1, 1], [], []>} : vector<16x512xbf16>, vector<512x256xbf16>, vector<16x256xf32> -> vector<16x256xf32>
    %19 = arith.addf %16, %18 : vector<16x256xf32>
    %c0_10 = arith.constant 0 : index
    %c0_11 = arith.constant 0 : index
    %20 = vector.load %arg8[%c0_10, %c0_11] : memref<16x256xf32, #tpu.memory_space<vmem>>, vector<16x256xf32>
    tpu.vector_store %arg8[%c0_10, %c0_11], %19 {strides = array<i32>} : memref<16x256xf32, #tpu.memory_space<vmem>>, vector<16x256xf32>,
    %c0_i32_12 = arith.constant 0 : i32
    %21 = arith.cmpi eq, %arg1, %c0_i32_12 : i32
    %22 = arith.extui %21 : i1 to i32
    %c0_i32_13 = arith.constant 0 : i32
    %23 = arith.cmpi ne, %22, %c0_i32_13 : i32
    scf.if %23 {
      %c0_14 = arith.constant 0 : index
      %c0_15 = arith.constant 0 : index
      %24 = vector.load %arg8[%c0_14, %c0_15] : memref<16x256xf32, #tpu.memory_space<vmem>>, vector<16x256xf32>
      %c0_16 = arith.constant 0 : index
      %c0_17 = arith.constant 0 : index
      %25 = vector.load %arg6[%c0_16, %c0_17] : memref<16x256xf32, #tpu.memory_space<vmem>>, vector<16x256xf32>
      tpu.vector_store %arg6[%c0_16, %c0_17], %24 {strides = array<i32>} : memref<16x256xf32, #tpu.memory_space<vmem>>, vector<16x256xf32>,
    } else {
    }
    return
  }
  func.func @transform_0(%arg0: i32, %arg1: i32) -> (i32, i32) {
    %c0_i32 = arith.constant 0 : i32
    %c0_i32_0 = arith.constant 0 : i32
    return %arg0, %c0_i32 : i32, i32
  }
  func.func @transform_1(%arg0: i32, %arg1: i32) -> (i32, i32) {
    %c0_i32 = arith.constant 0 : i32
    %c0_i32_0 = arith.constant 0 : i32
    %c0_i32_1 = arith.constant 0 : i32
    return %c0_i32, %c0_i32_0 : i32, i32
  }
  func.func @transform_2(%arg0: i32, %arg1: i32) -> (i32, i32) {
    %c0_i32 = arith.constant 0 : i32
    %c0_i32_0 = arith.constant 0 : i32
    return %c0_i32, %arg1 : i32, i32
  }
  func.func @transform_3(%arg0: i32, %arg1: i32) -> (i32, i32) {
    %c0_i32 = arith.constant 0 : i32
    %c0_i32_0 = arith.constant 0 : i32
    return %arg1, %c0_i32 : i32, i32
  }
  func.func @transform_4(%arg0: i32, %arg1: i32) -> (i32, i32) {
    %c0_i32 = arith.constant 0 : i32
    %c0_i32_0 = arith.constant 0 : i32
    return %arg0, %c0_i32 : i32, i32
  }
}

</mosaic_0001>

<bundles_post_ra>
// kernel: tpu_custom_call.1
= control target key start
LH: loop header
LB: loop body
LE: loop exit
PB: predicated region body
PF: predicated region fallthrough
CT: control target
= control target key end

     0   :  { %9 = vsyncpa [#allocation5], 0  ;;  %s2208_s0 = inlined_call_operand.hbm [shape: f32[16,256], index: 0, kind: input, shape index: {}]   ;;  %s2209_s1 = inlined_call_operand.vmem [shape: f32[1,256], index: 1, kind: input, shape index: {}]   ;;  %s2210_s2 = inlined_call_operand.hbm [shape: bf16[256,1024], index: 2, kind: input, shape index: {}]   ;;  %s2211_s3 = inlined_call_operand.hbm [shape: bf16[512,256], index: 3, kind: input, shape index: {}]   ;;  %s2212_s4 = inlined_call_operand.hbm [shape: f32[16,256], index: 4, kind: output, shape index: {}]  }
   0x1   :  { %10 = vsyncpa [#allocation8], 0 }
   0x2   :  { %11 = vsyncpa [#allocation6], 0  ;;  %s2073_s15 = smov [#allocation7]   ;;  %s1979_s19 = scalar_lea.hbm %s2210_s2, 16384 }
   0x3   :  { %s31_s16 = sshll.u32 %s2073_s15, 4  ;;  %p1980_p0 = scmp.ne.s32.totalorder %s2210_s2, %s1979_s19  ;;  %s32_s16 = int_to_ptr.vmem [resolvable:$true] %s31_s16 }
   0x4   :  { %p1983_p1 = scmp.lt.u32.totalorder %s1979_s19, %s2210_s2 }
   0x6   :  { %p1985_p2 = pnand %p1983_p1, %p1980_p0 }
   0x8   :  { %1988 = shalt.err (!%p1985_p2)
}
   0x9   :  { %s1989_s24 = scalar_lea.vmem %s32_s16, 16384  ;;  %p1994_p4 = scmp.lt.s32.totalorder %s32_s16, %s32_s16 }
   0xa   :  { %p1990_p3 = scmp.ne.s32.totalorder %s32_s16, %s1989_s24  ;;  %p1995_p5 = scmp.lt.s32.totalorder %s1989_s24, %s1989_s24 }
   0xc   :  { %p1996_p6 = por %p1995_p5, %p1994_p4 }
   0xe   :  { %p1997_p7 = pnand %p1996_p6, %p1990_p3 }
  0x10   :  { %2000 = shalt.err (!%p1997_p7)
}
  0x11   :  { %s2074_s25 = smov 512   ;;  %s2075_s26 = smov 32  }
  0x12   :  { %37 = dma.hbm_to_vmem [thread:$0]  %s2210_s2, 16384, %s32_s16, [#allocation8], %s2074_s25, %s2074_s25, %s2075_s26  }
  0x13   :  { %s2076_s29 = smov [#allocation4]   ;;  %s2001_s7 = scalar_lea.hbm %s2208_s0, 512 }
  0x14   :  { %s17_s30 = sshll.u32 %s2076_s29, 4  ;;  %p2002_p8 = scmp.ne.s32.totalorder %s2208_s0, %s2001_s7  ;;  %s18_s30 = int_to_ptr.vmem [resolvable:$true] %s17_s30 }
  0x15   :  { %p2005_p9 = scmp.lt.u32.totalorder %s2001_s7, %s2208_s0 }
  0x17   :  { %p2007_p10 = pnand %p2005_p9, %p2002_p8 }
  0x19   :  { %2010 = shalt.err (!%p2007_p10)
}
  0x1a   :  { %s2011_s12 = scalar_lea.vmem %s18_s30, 512  ;;  %p2016_p12 = scmp.lt.s32.totalorder %s18_s30, %s18_s30 }
  0x1b   :  { %p2012_p11 = scmp.ne.s32.totalorder %s18_s30, %s2011_s12  ;;  %p2017_p13 = scmp.lt.s32.totalorder %s2011_s12, %s2011_s12 }
  0x1d   :  { %p2018_p0 = por %p2017_p13, %p2016_p12 }
  0x1f   :  { %p2019_p1 = pnand %p2018_p0, %p2012_p11 }
  0x21   :  { %2022 = shalt.err (!%p2019_p1)
}
  0x22   :  { %s2077_s2 = smov 256   ;;  %s2078_s13 = smov 16  }
  0x23   :  { %23 = dma.hbm_to_vmem [thread:$0]  %s2208_s0, 512, %s18_s30, [#allocation5], %s2077_s2, %s2077_s2, %s2078_s13  }
  0x24   :  { %s2079_s16 = smov [#allocation9]   ;;  %s2023_s20 = scalar_lea.hbm %s2211_s3, 8192 }
  0x25   :  { %s43_s17 = sshll.u32 %s2079_s16, 4  ;;  %p2024_p2 = scmp.ne.s32.totalorder %s2211_s3, %s2023_s20  ;;  %s44_s17 = int_to_ptr.vmem [resolvable:$true] %s43_s17 }
  0x26   :  { %p2027_p3 = scmp.lt.u32.totalorder %s2023_s20, %s2211_s3 }
  0x28   :  { %p2029_p4 = pnand %p2027_p3, %p2024_p2 }
  0x2a   :  { %2032 = shalt.err (!%p2029_p4)
}
  0x2b   :  { %s2033_s25 = scalar_lea.vmem %s44_s17, 8192  ;;  %p2038_p6 = scmp.lt.s32.totalorder %s44_s17, %s44_s17 }
  0x2c   :  { %p2034_p5 = scmp.ne.s32.totalorder %s44_s17, %s2033_s25  ;;  %p2039_p7 = scmp.lt.s32.totalorder %s2033_s25, %s2033_s25 }
  0x2e   :  { %p2040_p8 = por %p2039_p7, %p2038_p6 }
  0x30   :  { %p2041_p9 = pnand %p2040_p8, %p2034_p5 }
  0x32   :  { %2044 = shalt.err (!%p2041_p9)
}
  0x33   :  { %s2080_s0 = smov 128   ;;  %s2081_s26 = smov 8  }
  0x34   :  { %49 = dma.hbm_to_vmem [thread:$0]  %s2211_s3, 8192, %s44_s17, [#allocation8], %s2080_s0, %s2080_s0, %s2081_s26  }
  0x35   :  { %2067 = dma.done.wait [#allocation5], 512  }
  0x36   :  { %2068 = vsyncadd [#allocation5], 4294966784 }
  0x37   :  { %2069 = dma.done.wait [#allocation8], 24576  }
  0x38   :  { %2070 = vsyncadd [#allocation8], 4294942720  ;;  %v2147_v0 = vld [vmem:[#allocation4] sm:$0xff]  ;;  %v2149_v1 = vld [vmem:[#allocation4 + $0x8] sm:$0xff] }
  0x39   :  { %v2151_v2 = vld [vmem:[#allocation4 + $0x10] sm:$0xff]  ;;  %v67_v3 = vmul.f32 %v2147_v0, %v2147_v0  ;;  %v68_v4 = vmul.f32 %v2149_v1, %v2149_v1  ;;  %v2157_v5 = vld [vmem:[#allocation4 + $0x18] sm:$0xff]  ;;  %v114_v7 = vld [vmem:[#allocation7] sm:$0xff] }
  0x3a   :  { %v69_v6 = vmul.f32 %v2151_v2, %v2151_v2  ;;  %v118_v8 = vld [vmem:[#allocation7 + $0x20] sm:$0xff]  ;;  %v70_v9 = vmul.f32 %v2157_v5, %v2157_v5  ;;  %v116_v12 = vld [vmem:[#allocation7 + $0x10] sm:$0xff] }
  0x3b   :  { %v1634_v10 = vcombine.high %v114_v7, %v118_v8  ;;  %v1633_v11 = vcombine.low %v114_v7, %v118_v8  ;;  %v120_v13 = vld [vmem:[#allocation7 + $0x30] sm:$0xff]  ;;  %v122_v14 = vld [vmem:[#allocation7 + $0x40] sm:$0xff]  ;;  %v71_v15 = vadd.f32 %v68_v4, %v67_v3 }
  0x3c   :  { %v1638_v16 = vcombine.high %v116_v12, %v120_v13  ;;  %v1637_v17 = vcombine.low %v116_v12, %v120_v13  ;;  %v126_v18 = vld [vmem:[#allocation7 + $0x60] sm:$0xff]  ;;  %v124_v19 = vld [vmem:[#allocation7 + $0x50] sm:$0xff]  ;;  %v74_v25 = vadd.f32 %v70_v9, %v69_v6 }
  0x3d   :  { %v128_v20 = vld [vmem:[#allocation7 + $0x70] sm:$0xff]  ;;  %882 = vmatprep.subr.bf16.mxu1 %v1634_v10  ;;  %v1642_v21 = vcombine.high %v122_v14, %v126_v18  ;;  %v130_v23 = vld [vmem:[#allocation7 + $0x80] sm:$0xff]  ;;  %72 = vadd.xlane.f32.xlu0 %v71_v15  ;;  %v1641_v26 = vcombine.low %v122_v14, %v126_v18 }
  0x3e   :  { %v1646_v22 = vcombine.high %v124_v19, %v128_v20  ;;  %v134_v24 = vld [vmem:[#allocation7 + $0xa0] sm:$0xff]  ;;  %883 = vmatpush1.bf16.msra.mxu1 %v1633_v11  ;;  %v132_v27 = vld [vmem:[#allocation7 + $0x90] sm:$0xff]  ;;  %968 = vmatprep.subr.bf16.mxu0 %v1638_v16  ;;  %v1645_v30 = vcombine.low %v124_v19, %v128_v20 }
  0x3f   :  { %v136_v28 = vld [vmem:[#allocation7 + $0xb0] sm:$0xff]  ;;  %884 = vmatprep.subr.bf16.mxu1 %v1642_v21  ;;  %v1650_v29 = vcombine.high %v130_v23, %v134_v24  ;;  %969 = vmatpush1.bf16.msra.mxu0 %v1637_v17  ;;  %v138_v31 = vld [vmem:[#allocation7 + $0xc0] sm:$0xff]  ;;  %v1649_v34 = vcombine.low %v130_v23, %v134_v24 }
  0x40   :  { %v142_v32 = vld [vmem:[#allocation7 + $0xe0] sm:$0xff]  ;;  %970 = vmatprep.subr.bf16.mxu0 %v1646_v22  ;;  %v1654_v33 = vcombine.high %v132_v27, %v136_v28  ;;  %v140_v35 = vld [vmem:[#allocation7 + $0xd0] sm:$0xff]  ;;  %v1653_v38 = vcombine.low %v132_v27, %v136_v28 }
  0x41   :  { %75 = vadd.xlane.f32.xlu0 %v74_v25  ;;  %v144_v36 = vld [vmem:[#allocation7 + $0xf0] sm:$0xff]  ;;  %v1658_v37 = vcombine.high %v138_v31, %v142_v32  ;;  %v146_v39 = vld [vmem:[#allocation7 + $0x100] sm:$0xff]  ;;  %v1657_v42 = vcombine.low %v138_v31, %v142_v32 }
  0x42   :  { %885 = vmatpush1.bf16.msra.mxu1 %v1641_v26  ;;  %v150_v40 = vld [vmem:[#allocation7 + $0x120] sm:$0xff]  ;;  %v1662_v41 = vcombine.high %v140_v35, %v144_v36  ;;  %v148_v43 = vld [vmem:[#allocation7 + $0x110] sm:$0xff]  ;;  %v1661_v48 = vcombine.low %v140_v35, %v144_v36 }
  0x43   :  { %886 = vmatprep.subr.bf16.mxu1 %v1650_v29  ;;  %971 = vmatpush1.bf16.msra.mxu0 %v1645_v30  ;;  %v152_v44 = vld [vmem:[#allocation7 + $0x130] sm:$0xff]  ;;  %v1666_v45 = vcombine.high %v146_v39, %v150_v40  ;;  %v154_v46 = vld [vmem:[#allocation7 + $0x140] sm:$0xff]  ;;  %v1665_v50 = vcombine.low %v146_v39, %v150_v40 }
  0x44   :  { %972 = vmatprep.subr.bf16.mxu0 %v1654_v33  ;;  %v158_v47 = vld [vmem:[#allocation7 + $0x160] sm:$0xff]  ;;  %v1670_v49 = vcombine.high %v148_v43, %v152_v44  ;;  %v156_v51 = vld [vmem:[#allocation7 + $0x150] sm:$0xff]  ;;  %v1669_v56 = vcombine.low %v148_v43, %v152_v44  ;;  %v2163_v43 = vld [vmem:[#allocation7 + $0x8] sm:$0xff] }
  0x45   :  { %v160_v52 = vld [vmem:[#allocation7 + $0x170] sm:$0xff]  ;;  %v1674_v53 = vcombine.high %v154_v46, %v158_v47  ;;  %v162_v54 = vld [vmem:[#allocation7 + $0x180] sm:$0xff]  ;;  %v1673_v58 = vcombine.low %v154_v46, %v158_v47  ;;  %v2165_v44 = vld [vmem:[#allocation7 + $0x28] sm:$0xff] }
  0x46   :  { %887 = vmatpush1.bf16.msra.mxu1 %v1649_v34  ;;  %v166_v55 = vld [vmem:[#allocation7 + $0x1a0] sm:$0xff]  ;;  %v1678_v57 = vcombine.high %v156_v51, %v160_v52  ;;  %v164_v59 = vld [vmem:[#allocation7 + $0x190] sm:$0xff]  ;;  %v1677_v3 = vcombine.low %v156_v51, %v160_v52  ;;  %v1635_v47 = vcombine.low %v2163_v43, %v2165_v44 }
  0x47   :  { %888 = vmatprep.subr.bf16.mxu1 %v1658_v37  ;;  %973 = vmatpush1.bf16.msra.mxu0 %v1653_v38  ;;  %v168_v60 = vld [vmem:[#allocation7 + $0x1b0] sm:$0xff]  ;;  %v1682_v61 = vcombine.high %v162_v54, %v166_v55  ;;  %v170_v62 = vld [vmem:[#allocation7 + $0x1c0] sm:$0xff]  ;;  %v1681_v6 = vcombine.low %v162_v54, %v166_v55 }
  0x48   :  { %974 = vmatprep.subr.bf16.mxu0 %v1662_v41  ;;  %v174_v63 = vld [vmem:[#allocation7 + $0x1e0] sm:$0xff]  ;;  %v1686_v4 = vcombine.high %v164_v59, %v168_v60  ;;  %v172_v7 = vld [vmem:[#allocation7 + $0x1d0] sm:$0xff]  ;;  %v1685_v10 = vcombine.low %v164_v59, %v168_v60 }
  0x49   :  { %v176_v8 = vld [vmem:[#allocation7 + $0x1f0] sm:$0xff]  ;;  %v1690_v9 = vcombine.high %v170_v62, %v174_v63  ;;  %v178_v11 = vld [vmem:[#allocation7 + $0x200] sm:$0xff]  ;;  %v1689_v14 = vcombine.low %v170_v62, %v174_v63 }
  0x4a   :  { %889 = vmatpush1.bf16.msra.mxu1 %v1657_v42  ;;  %v182_v12 = vld [vmem:[#allocation7 + $0x220] sm:$0xff]  ;;  %v1694_v13 = vcombine.high %v172_v7, %v176_v8  ;;  %v180_v15 = vld [vmem:[#allocation7 + $0x210] sm:$0xff]  ;;  %v1693_v20 = vcombine.low %v172_v7, %v176_v8 }
  0x4b   :  { %890 = vmatprep.subr.bf16.mxu1 %v1666_v45  ;;  %975 = vmatpush1.bf16.msra.mxu0 %v1661_v48  ;;  %v184_v16 = vld [vmem:[#allocation7 + $0x230] sm:$0xff]  ;;  %v1698_v17 = vcombine.high %v178_v11, %v182_v12  ;;  %v186_v18 = vld [vmem:[#allocation7 + $0x240] sm:$0xff]  ;;  %v1697_v24 = vcombine.low %v178_v11, %v182_v12 }
  0x4c   :  { %976 = vmatprep.subr.bf16.mxu0 %v1670_v49  ;;  %v190_v19 = vld [vmem:[#allocation7 + $0x260] sm:$0xff]  ;;  %v188_v21 = vld [vmem:[#allocation7 + $0x250] sm:$0xff]  ;;  %v1702_v23 = vcombine.high %v180_v15, %v184_v16  ;;  %v1701_v28 = vcombine.low %v180_v15, %v184_v16 }
  0x4d   :  { %v192_v22 = vld [vmem:[#allocation7 + $0x270] sm:$0xff]  ;;  %v194_v25 = vld [vmem:[#allocation7 + $0x280] sm:$0xff]  ;;  %v1706_v27 = vcombine.high %v186_v18, %v190_v19  ;;  %v1705_v32 = vcombine.low %v186_v18, %v190_v19 }
  0x4e   :  { %891 = vmatpush1.bf16.msra.mxu1 %v1665_v50  ;;  %v198_v26 = vld [vmem:[#allocation7 + $0x2a0] sm:$0xff]  ;;  %v196_v29 = vld [vmem:[#allocation7 + $0x290] sm:$0xff]  ;;  %v1710_v31 = vcombine.high %v188_v21, %v192_v22  ;;  %v1709_v36 = vcombine.low %v188_v21, %v192_v22 }
  0x4f   :  { %892 = vmatprep.subr.bf16.mxu1 %v1674_v53  ;;  %977 = vmatpush1.bf16.msra.mxu0 %v1669_v56  ;;  %v200_v30 = vld [vmem:[#allocation7 + $0x2b0] sm:$0xff]  ;;  %v202_v33 = vld [vmem:[#allocation7 + $0x2c0] sm:$0xff]  ;;  %v1714_v35 = vcombine.high %v194_v25, %v198_v26  ;;  %v1713_v40 = vcombine.low %v194_v25, %v198_v26 }
  0x50   :  { %978 = vmatprep.subr.bf16.mxu0 %v1678_v57  ;;  %v206_v34 = vld [vmem:[#allocation7 + $0x2e0] sm:$0xff]  ;;  %v204_v37 = vld [vmem:[#allocation7 + $0x2d0] sm:$0xff]  ;;  %v1718_v39 = vcombine.high %v196_v29, %v200_v30  ;;  %v1717_v46 = vcombine.low %v196_v29, %v200_v30 }
  0x51   :  { %v208_v38 = vld [vmem:[#allocation7 + $0x2f0] sm:$0xff]  ;;  %v210_v41 = vld [vmem:[#allocation7 + $0x300] sm:$0xff]  ;;  %v1722_v45 = vcombine.high %v202_v33, %v206_v34  ;;  %v1721_v49 = vcombine.low %v202_v33, %v206_v34 }
  0x52   :  { %893 = vmatpush1.bf16.msra.mxu1 %v1673_v58  ;;  %v214_v42 = vld [vmem:[#allocation7 + $0x320] sm:$0xff]  ;;  %v1726_v48 = vcombine.high %v204_v37, %v208_v38  ;;  %v212_v50 = vld [vmem:[#allocation7 + $0x310] sm:$0xff]  ;;  %v1725_v53 = vcombine.low %v204_v37, %v208_v38 }
  0x53   :  { %894 = vmatprep.subr.bf16.mxu1 %v1682_v61  ;;  %979 = vmatpush1.bf16.msra.mxu0 %v1677_v3  ;;  %v216_v51 = vld [vmem:[#allocation7 + $0x330] sm:$0xff]  ;;  %v1730_v52 = vcombine.high %v210_v41, %v214_v42  ;;  %v218_v54 = vld [vmem:[#allocation7 + $0x340] sm:$0xff]  ;;  %v1729_v57 = vcombine.low %v210_v41, %v214_v42 }
  0x54   :  { %980 = vmatprep.subr.bf16.mxu0 %v1686_v4  ;;  %v222_v55 = vld [vmem:[#allocation7 + $0x360] sm:$0xff]  ;;  %v1734_v56 = vcombine.high %v212_v50, %v216_v51  ;;  %v220_v58 = vld [vmem:[#allocation7 + $0x350] sm:$0xff]  ;;  %v1733_v61 = vcombine.low %v212_v50, %v216_v51 }
  0x55   :  { %v224_v59 = vld [vmem:[#allocation7 + $0x370] sm:$0xff]  ;;  %v1738_v60 = vcombine.high %v218_v54, %v222_v55  ;;  %v226_v62 = vld [vmem:[#allocation7 + $0x380] sm:$0xff]  ;;  %v1737_v4 = vcombine.low %v218_v54, %v222_v55 }
  0x56   :  { %895 = vmatpush1.bf16.msra.mxu1 %v1681_v6  ;;  %v230_v63 = vld [vmem:[#allocation7 + $0x3a0] sm:$0xff]  ;;  %v1742_v3 = vcombine.high %v220_v58, %v224_v59  ;;  %v228_v6 = vld [vmem:[#allocation7 + $0x390] sm:$0xff] }
  0x57   :  { %896 = vmatprep.subr.bf16.mxu1 %v1690_v9  ;;  %981 = vmatpush1.bf16.msra.mxu0 %v1685_v10  ;;  %v232_v7 = vld [vmem:[#allocation7 + $0x3b0] sm:$0xff]  ;;  %v1746_v8 = vcombine.high %v226_v62, %v230_v63  ;;  %v1741_v9 = vcombine.low %v220_v58, %v224_v59  ;;  %v234_v10 = vld [vmem:[#allocation7 + $0x3c0] sm:$0xff] }
  0x58   :  { %982 = vmatprep.subr.bf16.mxu0 %v1694_v13  ;;  %v238_v11 = vld [vmem:[#allocation7 + $0x3e0] sm:$0xff]  ;;  %v1750_v12 = vcombine.high %v228_v6, %v232_v7  ;;  %v1745_v13 = vcombine.low %v226_v62, %v230_v63  ;;  %v240_v15 = vld [vmem:[#allocation7 + $0x3f0] sm:$0xff]  ;;  %v147_v62 = vld [vmem:[#allocation7 + $0x108] sm:$0xff] }
  0x59   :  { %v1754_v16 = vcombine.high %v234_v10, %v238_v11  ;;  %v1753_v19 = vcombine.low %v234_v10, %v238_v11  ;;  %v88_v33 = vld [vmem:[%s2209_s1] sm:$0x3]  ;;  %v1852_v54 = vld [vmem:[#allocation9 + $0x14] ss:$8 sps:$4 sm:$0xff]   ;;  %v1850_v58 = vld [vmem:[#allocation9 + $0x10] ss:$8 sps:$4 sm:$0xff]  }
  0x5a   :  { %897 = vmatpush1.bf16.msra.mxu1 %v1689_v14  ;;  %v236_v14 = vld [vmem:[#allocation7 + $0x3d0] sm:$0xff]  ;;  %v1855_v59 = vld [vmem:[#allocation9 + $0x24] ss:$8 sps:$4 sm:$0xff]   ;;  %s2082_s1 = smov [#allocation10]  }
  0x5b   :  { %898 = vmatprep.subr.bf16.mxu1 %v1698_v17  ;;  %983 = vmatpush1.bf16.msra.mxu0 %v1693_v20  ;;  %v1749_v17 = vcombine.low %v228_v6, %v232_v7  ;;  %v1758_v18 = vcombine.high %v236_v14, %v240_v15  ;;  %v1636_v20 = vcombine.high %v2163_v43, %v2165_v44  ;;  %v151_v43 = vld [vmem:[#allocation7 + $0x128] sm:$0xff]  ;;  %v1856_v7 = vld [vmem:[#allocation9 + $0x30] ss:$8 sps:$4 sm:$0xff]   ;;  %s1620_s30 = sshll.u32 %s2082_s1, 4  ;;  %s1621_s30 = int_to_ptr.vmem [resolvable:$true] %s1620_s30 }
  0x5c   :  { %984 = vmatprep.subr.bf16.mxu0 %v1702_v23  ;;  %v1757_v21 = vcombine.low %v236_v14, %v240_v15  ;;  %v1853_v44 = vld [vmem:[#allocation9 + $0x20] ss:$8 sps:$4 sm:$0xff]   ;;  %v1864_v14 = vld [vmem:[#allocation9 + $0x54] ss:$8 sps:$4 sm:$0xff]   ;;  %s2045_s5 = scalar_lea.vmem %s1621_s30, 512  ;;  %p2050_p11 = scmp.lt.s32.totalorder %s1621_s30, %s1621_s30 }
  0x5d   :  { %v159_v6 = vld [vmem:[#allocation7 + $0x168] sm:$0xff]  ;;  %p2046_p10 = scmp.ne.s32.totalorder %s1621_s30, %s2045_s5  ;;  %p2051_p12 = scmp.lt.s32.totalorder %s2045_s5, %s2045_s5 }
  0x5e   :  { %899 = vmatpush1.bf16.msra.mxu1 %v1697_v24  ;;  %v163_v11 = vld [vmem:[#allocation7 + $0x188] sm:$0xff] }
  0x5f   :  { %900 = vmatprep.subr.bf16.mxu1 %v1706_v27  ;;  %985 = vmatpush1.bf16.msra.mxu0 %v1701_v28  ;;  %v90_v27 = vlaneseq  ;;  %p2052_p13 = por %p2051_p12, %p2050_p11 }
  0x60   :  { %986 = vmatprep.subr.bf16.mxu0 %v1710_v31 }
  0x61   :  { %v91_v29 = vshrl.u32 %v90_v27, 7  ;;  %p2053_p0 = pnand %p2052_p13, %p2046_p10 }
  0x62   :  { %901 = vmatpush1.bf16.msra.mxu1 %v1705_v32 }
  0x63   :  { %902 = vmatprep.subr.bf16.mxu1 %v1714_v35  ;;  %987 = vmatpush1.bf16.msra.mxu0 %v1709_v36  ;;  %v96_v30 = vsub.s32 1, %v91_v29  ;;  %v92_v31 = vsub.s32 0, %v91_v29  ;;  %v191_v29 = vld [vmem:[#allocation7 + $0x268] sm:$0xff] }
  0x64   :  { %988 = vmatprep.subr.bf16.mxu0 %v1718_v39 }
  0x65   :  { %v97_v35 = vrot.slane %v88_v33, %v96_v30  ;;  %v93_v37 = vrot.slane %v88_v33, %v92_v31  ;;  %v199_v33 = vld [vmem:[#allocation7 + $0x2a8] sm:$0xff] }
  0x66   :  { %903 = vmatpush1.bf16.msra.mxu1 %v1713_v40 }
  0x67   :  { %904 = vmatprep.subr.bf16.mxu1 %v1722_v45  ;;  %989 = vmatpush1.bf16.msra.mxu0 %v1717_v46 }
  0x68   :  { %990 = vmatprep.subr.bf16.mxu0 %v1726_v48  ;;  %v123_v48 = vld [vmem:[#allocation7 + $0x48] sm:$0xff] }
  0x6a   :  { %905 = vmatpush1.bf16.msra.mxu1 %v1721_v49  ;;  %v127_v49 = vld [vmem:[#allocation7 + $0x68] sm:$0xff] }
  0x6b   :  { %906 = vmatprep.subr.bf16.mxu1 %v1730_v52  ;;  %991 = vmatpush1.bf16.msra.mxu0 %v1725_v53  ;;  %v135_v52 = vld [vmem:[#allocation7 + $0xa8] sm:$0xff]  ;;  %v1643_v53 = vcombine.low %v123_v48, %v127_v49 }
  0x6c   :  { %992 = vmatprep.subr.bf16.mxu0 %v1734_v56  ;;  %v139_v56 = vld [vmem:[#allocation7 + $0xc8] sm:$0xff] }
  0x6e   :  { %907 = vmatpush1.bf16.msra.mxu1 %v1729_v57  ;;  %v143_v57 = vld [vmem:[#allocation7 + $0xe8] sm:$0xff] }
  0x6f   :  { %908 = vmatprep.subr.bf16.mxu1 %v1738_v60  ;;  %993 = vmatpush1.bf16.msra.mxu0 %v1733_v61  ;;  %v1660_v61 = vcombine.high %v139_v56, %v143_v57  ;;  %v1659_v63 = vcombine.low %v139_v56, %v143_v57  ;;  %v117_v57 = vld [vmem:[#allocation7 + $0x18] sm:$0xff] }
  0x70   :  { %994 = vmatprep.subr.bf16.mxu0 %v1742_v3  ;;  %v1668_v3 = vcombine.high %v147_v62, %v151_v43 }
  0x72   :  { %909 = vmatpush1.bf16.msra.mxu1 %v1737_v4  ;;  %v155_v4 = vld [vmem:[#allocation7 + $0x148] sm:$0xff] }
  0x73   :  { %910 = vmatprep.subr.bf16.mxu1 %v1746_v8  ;;  %995 = vmatpush1.bf16.msra.mxu0 %v1741_v9  ;;  %v1861_v8 = vld [vmem:[#allocation9 + $0x44] ss:$8 sps:$4 sm:$0xff]   ;;  %v1667_v9 = vcombine.low %v147_v62, %v151_v43  ;;  %v1676_v10 = vcombine.high %v155_v4, %v159_v6  ;;  %v1675_v15 = vcombine.low %v155_v4, %v159_v6  ;;  %v129_v62 = vld [vmem:[#allocation7 + $0x78] sm:$0xff] }
  0x74   :  { %996 = vmatprep.subr.bf16.mxu0 %v1750_v12  ;;  %v167_v12 = vld [vmem:[#allocation7 + $0x1a8] sm:$0xff]  ;;  %v141_v6 = vld [vmem:[#allocation7 + $0xd8] sm:$0xff] }
  0x76   :  { %911 = vmatpush1.bf16.msra.mxu1 %v1745_v13  ;;  %v1859_v13 = vld [vmem:[#allocation9 + $0x40] ss:$8 sps:$4 sm:$0xff]  }
  0x77   :  { %912 = vmatprep.subr.bf16.mxu1 %v1754_v16  ;;  %997 = vmatpush1.bf16.msra.mxu0 %v1749_v17  ;;  %v1684_v16 = vcombine.high %v163_v11, %v167_v12  ;;  %v171_v17 = vld [vmem:[#allocation7 + $0x1c8] sm:$0xff] }
  0x78   :  { %998 = vmatprep.subr.bf16.mxu0 %v1758_v18  ;;  %v175_v18 = vld [vmem:[#allocation7 + $0x1e8] sm:$0xff] }
  0x7a   :  { %913 = vmatpush1.bf16.msra.mxu1 %v1753_v19  ;;  %v1862_v19 = vld [vmem:[#allocation9 + $0x50] ss:$8 sps:$4 sm:$0xff]  }
  0x7b   :  { %925 = vmatprep.subr.bf16.mxu1 %v1636_v20  ;;  %999 = vmatpush1.bf16.msra.mxu0 %v1757_v21  ;;  %v1867_v20 = vld [vmem:[#allocation9 + $0x64] ss:$8 sps:$4 sm:$0xff]   ;;  %v1683_v21 = vcombine.low %v163_v11, %v167_v12  ;;  %v153_v11 = vld [vmem:[#allocation7 + $0x138] sm:$0xff] }
  0xca   :  { %v73_v22 = vpop.xlane.xlu0 %72 }
  0xcb   :  { %v78_v23 = vmul.f32 0.00390625, %v73_v22  ;;  %v1692_v22 = vcombine.high %v171_v17, %v175_v18 }
  0xcd   :  { %v80_v24 = vadd.f32 1e-06, %v78_v23  ;;  %v179_v23 = vld [vmem:[#allocation7 + $0x208] sm:$0xff] }
  0xce   :  { %v76_v25 = vpop.xlane.xlu0 %75 }
  0xcf   :  { %1943 = vrsqrt.f32 %v80_v24  ;;  %v79_v26 = vmul.f32 0.00390625, %v76_v25  ;;  %v183_v24 = vld [vmem:[#allocation7 + $0x228] sm:$0xff] }
  0xd0   :  { %v1865_v25 = vld [vmem:[#allocation9 + $0x60] ss:$8 sps:$4 sm:$0xff]   ;;  %v1700_v27 = vcombine.high %v179_v23, %v183_v24  ;;  %v1699_v30 = vcombine.low %v179_v23, %v183_v24  ;;  %v1870_v23 = vld [vmem:[#allocation9 + $0x74] ss:$8 sps:$4 sm:$0xff]   ;;  %v1868_v24 = vld [vmem:[#allocation9 + $0x70] ss:$8 sps:$4 sm:$0xff]  }
  0xd1   :  { %v81_v28 = vadd.f32 1e-06, %v79_v26  ;;  %v1691_v26 = vcombine.low %v171_v17, %v175_v18  ;;  %v165_v17 = vld [vmem:[#allocation7 + $0x198] sm:$0xff] }
  0xd2   :  { %v169_v18 = vld [vmem:[#allocation7 + $0x1b8] sm:$0xff] }
  0xd3   :  { %1945 = vrsqrt.f32 %v81_v28  ;;  %v187_v28 = vld [vmem:[#allocation7 + $0x248] sm:$0xff] }
  0xd4   :  { %v1708_v31 = vcombine.high %v187_v28, %v191_v29 }
  0xd9   :  { %v1944_v32 = vpop.eup %1943 }
  0xda   :  { %v85_v34 = vmul.f32 %v1944_v32, %v2149_v1  ;;  %v84_v36 = vmul.f32 %v1944_v32, %v2147_v0  ;;  %v1644_v1 = vcombine.high %v123_v48, %v127_v49  ;;  %v131_v0 = vld [vmem:[#allocation7 + $0x88] sm:$0xff] }
  0xdb   :  { %v1652_v55 = vcombine.high %v131_v0, %v135_v52  ;;  %v1651_v60 = vcombine.low %v131_v0, %v135_v52  ;;  %v195_v32 = vld [vmem:[#allocation7 + $0x288] sm:$0xff] }
  0xdc   :  { %v101_v41 = vmul.f32 %v97_v35, %v85_v34  ;;  %v100_v45 = vmul.f32 %v93_v37, %v84_v36  ;;  %v1707_v34 = vcombine.low %v187_v28, %v191_v29  ;;  %v203_v36 = vld [vmem:[#allocation7 + $0x2c8] sm:$0xff]  ;;  %v185_v28 = vld [vmem:[#allocation7 + $0x238] sm:$0xff] }
  0xdd   :  { %v1946_v38 = vpop.eup %1945  ;;  %v223_v48 = vld [vmem:[#allocation7 + $0x368] sm:$0xff] }
  0xde   :  { %v87_v39 = vmul.f32 %v1946_v38, %v2157_v5  ;;  %v86_v40 = vmul.f32 %v1946_v38, %v2151_v2  ;;  %v1847_v2 = vld [vmem:[#allocation9] ss:$8 sps:$4 sm:$0xff]   ;;  %v1849_v5 = vld [vmem:[#allocation9 + $0x4] ss:$8 sps:$4 sm:$0xff]   ;;  %v1715_v38 = vcombine.low %v195_v32, %v199_v33 }
  0xdf   :  { %1510 = vmatprep.subr.bf16.mxu0 %v1849_v5  ;;  %v227_v0 = vld [vmem:[#allocation7 + $0x388] sm:$0xff] }
  0xe0   :  { %v103_v42 = vmul.f32 %v97_v35, %v87_v39  ;;  %v102_v46 = vmul.f32 %v93_v37, %v86_v40  ;;  %v1716_v35 = vcombine.high %v195_v32, %v199_v33  ;;  %v207_v37 = vld [vmem:[#allocation7 + $0x2e8] sm:$0xff]  ;;  %v189_v33 = vld [vmem:[#allocation7 + $0x258] sm:$0xff] }
  0xe1   :  { %v1724_v39 = vcombine.high %v203_v36, %v207_v37  ;;  %v211_v40 = vld [vmem:[#allocation7 + $0x308] sm:$0xff] }
  0xe2   :  { %v2178_v50 = vpack.c.bf16 %v103_v42, %v101_v41  ;;  %v2180_v51 = vpack.c.bf16 %v102_v46, %v100_v45  ;;  %v215_v41 = vld [vmem:[#allocation7 + $0x328] sm:$0xff]  ;;  %v1723_v42 = vcombine.low %v203_v36, %v207_v37  ;;  %v1874_v36 = vld [vmem:[#allocation9 + $0x90] ss:$8 sps:$4 sm:$0xff]  }
  0xe3   :  { %v1732_v45 = vcombine.high %v211_v40, %v215_v41  ;;  %v219_v46 = vld [vmem:[#allocation7 + $0x348] sm:$0xff]  ;;  %v1731_v49 = vcombine.low %v211_v40, %v215_v41  ;;  %v201_v40 = vld [vmem:[#allocation7 + $0x2b8] sm:$0xff] }
  0xe4   :  { %914 = vmatprep.mubr.bf16.mxu1 %v2178_v50  ;;  %1000 = vmatprep.mubr.bf16.mxu0 %v2178_v50  ;;  %v231_v52 = vld [vmem:[#allocation7 + $0x3a8] sm:$0xff] }
  0xe5   :  { %915 = vmatmul.mubr.bf16.vlgmr.msra.gmra.mrb[0].mxu1 %v2180_v51  ;;  %1001 = vmatmul.mubr.bf16.vlgmr.msra.gmra.mrb[0].mxu0 %v2180_v51  ;;  %v1748_v5 = vcombine.high %v227_v0, %v231_v52  ;;  %v1873_v29 = vld [vmem:[#allocation9 + $0x84] ss:$8 sps:$4 sm:$0xff]  }
  0xe6   :  { %926 = vmatpush1.bf16.msra.mxu1 %v1635_v47  ;;  %957 = vmatprep.mubr.bf16.mxu1 %v2178_v50  ;;  %v1858_v47 = vld [vmem:[#allocation9 + $0x34] ss:$8 sps:$4 sm:$0xff]   ;;  %v1879_v41 = vld [vmem:[#allocation9 + $0xa4] ss:$8 sps:$4 sm:$0xff]  }
  0xe7   :  { %927 = vmatprep.subr.bf16.mxu1 %v1644_v1  ;;  %1511 = vmatpush1.bf16.msra.mxu0 %v1847_v2  ;;  %v1740_v1 = vcombine.high %v219_v46, %v223_v48  ;;  %v1739_v2 = vcombine.low %v219_v46, %v223_v48  ;;  %v205_v48 = vld [vmem:[#allocation7 + $0x2d8] sm:$0xff] }
  0xe8   :  { %1512 = vmatprep.subr.bf16.mxu0 %v1852_v54  ;;  %v239_v54 = vld [vmem:[#allocation7 + $0x3e8] sm:$0xff] }
  0xea   :  { %928 = vmatpush1.bf16.msra.mxu1 %v1643_v53  ;;  %v235_v53 = vld [vmem:[#allocation7 + $0x3c8] sm:$0xff] }
  0xeb   :  { %929 = vmatprep.subr.bf16.mxu1 %v1652_v55  ;;  %1513 = vmatpush1.bf16.msra.mxu0 %v1850_v58  ;;  %v1747_v55 = vcombine.low %v227_v0, %v231_v52  ;;  %v1756_v56 = vcombine.high %v235_v53, %v239_v54  ;;  %v121_v58 = vld [vmem:[#allocation7 + $0x38] sm:$0xff] }
  0xec   :  { %1514 = vmatprep.subr.bf16.mxu0 %v1855_v59  ;;  %v1755_v59 = vcombine.low %v235_v53, %v239_v54  ;;  %v1639_v43 = vcombine.low %v117_v57, %v121_v58  ;;  %v1880_v0 = vld [vmem:[#allocation9 + $0xb0] ss:$8 sps:$4 sm:$0xff]   ;;  %v1885_v54 = vld [vmem:[#allocation9 + $0xc4] ss:$8 sps:$4 sm:$0xff]  }
  0xed   :  { %v217_v53 = vld [vmem:[#allocation7 + $0x338] sm:$0xff] }
  0xee   :  { %930 = vmatpush1.bf16.msra.mxu1 %v1651_v60  ;;  %v1640_v60 = vcombine.high %v117_v57, %v121_v58  ;;  %v221_v58 = vld [vmem:[#allocation7 + $0x358] sm:$0xff] }
  0xef   :  { %931 = vmatprep.subr.bf16.mxu1 %v1660_v61  ;;  %1515 = vmatpush1.bf16.msra.mxu0 %v1853_v44  ;;  %v125_v61 = vld [vmem:[#allocation7 + $0x58] sm:$0xff] }
  0xf0   :  { %1516 = vmatprep.subr.bf16.mxu0 %v1858_v47  ;;  %v1648_v44 = vcombine.high %v125_v61, %v129_v62  ;;  %v133_v47 = vld [vmem:[#allocation7 + $0x98] sm:$0xff] }
  0xf2   :  { %932 = vmatpush1.bf16.msra.mxu1 %v1659_v63  ;;  %v137_v63 = vld [vmem:[#allocation7 + $0xb8] sm:$0xff] }
  0xf3   :  { %933 = vmatprep.subr.bf16.mxu1 %v1668_v3  ;;  %1517 = vmatpush1.bf16.msra.mxu0 %v1856_v7  ;;  %v1647_v3 = vcombine.low %v125_v61, %v129_v62  ;;  %v1656_v4 = vcombine.high %v133_v47, %v137_v63  ;;  %v145_v7 = vld [vmem:[#allocation7 + $0xf8] sm:$0xff] }
  0xf4   :  { %1518 = vmatprep.subr.bf16.mxu0 %v1861_v8  ;;  %v1655_v8 = vcombine.low %v133_v47, %v137_v63  ;;  %v1663_v12 = vcombine.low %v141_v6, %v145_v7  ;;  %v1886_v61 = vld [vmem:[#allocation9 + $0xd0] ss:$8 sps:$4 sm:$0xff]   ;;  %v1891_v63 = vld [vmem:[#allocation9 + $0xe4] ss:$8 sps:$4 sm:$0xff]  }
  0xf5   :  { %v233_v47 = vld [vmem:[#allocation7 + $0x3b8] sm:$0xff] }
  0xf6   :  { %934 = vmatpush1.bf16.msra.mxu1 %v1667_v9  ;;  %v1664_v9 = vcombine.high %v141_v6, %v145_v7  ;;  %v237_v7 = vld [vmem:[#allocation7 + $0x3d8] sm:$0xff] }
  0xf7   :  { %935 = vmatprep.subr.bf16.mxu1 %v1676_v10  ;;  %1519 = vmatpush1.bf16.msra.mxu0 %v1859_v13  ;;  %v149_v10 = vld [vmem:[#allocation7 + $0x118] sm:$0xff] }
  0xf8   :  { %1520 = vmatprep.subr.bf16.mxu0 %v1864_v14  ;;  %v1672_v13 = vcombine.high %v149_v10, %v153_v11  ;;  %v157_v14 = vld [vmem:[#allocation7 + $0x158] sm:$0xff] }
  0xfa   :  { %936 = vmatpush1.bf16.msra.mxu1 %v1675_v15  ;;  %v161_v15 = vld [vmem:[#allocation7 + $0x178] sm:$0xff] }
  0xfb   :  { %937 = vmatprep.subr.bf16.mxu1 %v1684_v16  ;;  %1521 = vmatpush1.bf16.msra.mxu0 %v1862_v19  ;;  %v1671_v16 = vcombine.low %v149_v10, %v153_v11  ;;  %v1679_v19 = vcombine.low %v157_v14, %v161_v15  ;;  %v1892_v10 = vld [vmem:[#allocation9 + $0xf0] ss:$8 sps:$4 sm:$0xff]  }
  0xfc   :  { %1522 = vmatprep.subr.bf16.mxu0 %v1867_v20  ;;  %v1688_v20 = vcombine.high %v165_v17, %v169_v18 }
  0xfe   :  { %938 = vmatpush1.bf16.msra.mxu1 %v1683_v21  ;;  %v173_v21 = vld [vmem:[#allocation7 + $0x1d8] sm:$0xff] }
  0xff   :  { %939 = vmatprep.subr.bf16.mxu1 %v1692_v22  ;;  %1523 = vmatpush1.bf16.msra.mxu0 %v1865_v25  ;;  %v177_v22 = vld [vmem:[#allocation7 + $0x1f8] sm:$0xff]  ;;  %v1687_v25 = vcombine.low %v165_v17, %v169_v18 }
 0x100   :  { %1524 = vmatprep.subr.bf16.mxu0 %v1870_v23 }
 0x102   :  { %940 = vmatpush1.bf16.msra.mxu1 %v1691_v26  ;;  %v1696_v26 = vcombine.high %v173_v21, %v177_v22 }
 0x103   :  { %941 = vmatprep.subr.bf16.mxu1 %v1700_v27  ;;  %1525 = vmatpush1.bf16.msra.mxu0 %v1868_v24  ;;  %v181_v27 = vld [vmem:[#allocation7 + $0x218] sm:$0xff] }
 0x104   :  { %1526 = vmatprep.subr.bf16.mxu0 %v1873_v29  ;;  %v1704_v32 = vcombine.high %v181_v27, %v185_v28  ;;  %v1703_v37 = vcombine.low %v181_v27, %v185_v28 }
 0x106   :  { %942 = vmatpush1.bf16.msra.mxu1 %v1699_v30  ;;  %v1871_v30 = vld [vmem:[#allocation9 + $0x80] ss:$8 sps:$4 sm:$0xff]  }
 0x107   :  { %943 = vmatprep.subr.bf16.mxu1 %v1708_v31  ;;  %v1695_v31 = vcombine.low %v173_v21, %v177_v22  ;;  %1527 = vmatpush1.bf16.msra.mxu0 %v1871_v30 }
 0x10a   :  { %944 = vmatpush1.bf16.msra.mxu1 %v1707_v34  ;;  %v193_v34 = vld [vmem:[#allocation7 + $0x278] sm:$0xff] }
 0x10b   :  { %945 = vmatprep.subr.bf16.mxu1 %v1716_v35  ;;  %v1876_v35 = vld [vmem:[#allocation9 + $0x94] ss:$8 sps:$4 sm:$0xff]  }
 0x10c   :  { %1528 = vmatprep.subr.bf16.mxu0 %v1876_v35 }
 0x10d   :  { %1529 = vmatpush1.bf16.msra.mxu0 %v1874_v36 }
 0x10e   :  { %946 = vmatpush1.bf16.msra.mxu1 %v1715_v38  ;;  %v1712_v38 = vcombine.high %v189_v33, %v193_v34  ;;  %1530 = vmatprep.subr.bf16.mxu0 %v1879_v41 }
 0x10f   :  { %947 = vmatprep.subr.bf16.mxu1 %v1724_v39  ;;  %v197_v39 = vld [vmem:[#allocation7 + $0x298] sm:$0xff] }
 0x110   :  { %v1720_v46 = vcombine.high %v197_v39, %v201_v40  ;;  %v1719_v52 = vcombine.low %v197_v39, %v201_v40 }
 0x112   :  { %948 = vmatpush1.bf16.msra.mxu1 %v1723_v42  ;;  %v1877_v42 = vld [vmem:[#allocation9 + $0xa0] ss:$8 sps:$4 sm:$0xff]  }
 0x113   :  { %949 = vmatprep.subr.bf16.mxu1 %v1732_v45  ;;  %v1711_v45 = vcombine.low %v189_v33, %v193_v34  ;;  %1531 = vmatpush1.bf16.msra.mxu0 %v1877_v42 }
 0x116   :  { %950 = vmatpush1.bf16.msra.mxu1 %v1731_v49  ;;  %v209_v49 = vld [vmem:[#allocation7 + $0x2f8] sm:$0xff] }
 0x117   :  { %951 = vmatprep.subr.bf16.mxu1 %v1740_v1  ;;  %v1882_v1 = vld [vmem:[#allocation9 + $0xb4] ss:$8 sps:$4 sm:$0xff]  }
 0x118   :  { %1532 = vmatprep.subr.bf16.mxu0 %v1882_v1  ;;  %v1895_v1 = vld [vmem:[#allocation9 + $0x100] ss:$8 sps:$4 sm:$0xff]  }
 0x119   :  { %1533 = vmatpush1.bf16.msra.mxu0 %v1880_v0  ;;  %v1900_v0 = vld [vmem:[#allocation9 + $0x114] ss:$8 sps:$4 sm:$0xff]  }
 0x11a   :  { %952 = vmatpush1.bf16.msra.mxu1 %v1739_v2  ;;  %v1728_v2 = vcombine.high %v205_v48, %v209_v49  ;;  %1534 = vmatprep.subr.bf16.mxu0 %v1885_v54  ;;  %v1904_v54 = vld [vmem:[#allocation9 + $0x130] ss:$8 sps:$4 sm:$0xff]  }
 0x11b   :  { %953 = vmatprep.subr.bf16.mxu1 %v1748_v5  ;;  %v213_v5 = vld [vmem:[#allocation7 + $0x318] sm:$0xff] }
 0x11c   :  { %v1736_v57 = vcombine.high %v213_v5, %v217_v53  ;;  %v1735_v62 = vcombine.low %v213_v5, %v217_v53  ;;  %v1901_v5 = vld [vmem:[#allocation9 + $0x120] ss:$8 sps:$4 sm:$0xff]   ;;  %v1906_v53 = vld [vmem:[#allocation9 + $0x134] ss:$8 sps:$4 sm:$0xff]  }
 0x11e   :  { %954 = vmatpush1.bf16.msra.mxu1 %v1747_v55  ;;  %v1883_v55 = vld [vmem:[#allocation9 + $0xc0] ss:$8 sps:$4 sm:$0xff]  }
 0x11f   :  { %955 = vmatprep.subr.bf16.mxu1 %v1756_v56  ;;  %v1727_v56 = vcombine.low %v205_v48, %v209_v49  ;;  %1535 = vmatpush1.bf16.msra.mxu0 %v1883_v55  ;;  %v1909_v55 = vld [vmem:[#allocation9 + $0x144] ss:$8 sps:$4 sm:$0xff]  }
 0x122   :  { %956 = vmatpush1.bf16.msra.mxu1 %v1755_v59  ;;  %v225_v59 = vld [vmem:[#allocation7 + $0x378] sm:$0xff] }
 0x123   :  { %1011 = vmatprep.subr.bf16.mxu1 %v1640_v60  ;;  %v1888_v60 = vld [vmem:[#allocation9 + $0xd4] ss:$8 sps:$4 sm:$0xff]  }
 0x124   :  { %1536 = vmatprep.subr.bf16.mxu0 %v1888_v60  ;;  %v1913_v60 = vld [vmem:[#allocation9 + $0x160] ss:$8 sps:$4 sm:$0xff]  }
 0x125   :  { %958 = vmatmul.mubr.bf16.vlgmr.msra.gmra.mrb[4].mxu1 %v2180_v51  ;;  %1537 = vmatpush1.bf16.msra.mxu0 %v1886_v61  ;;  %v1918_v61 = vld [vmem:[#allocation9 + $0x174] ss:$8 sps:$4 sm:$0xff]  }
 0x126   :  { %1012 = vmatpush1.bf16.msra.mxu1 %v1639_v43  ;;  %1043 = vmatprep.mubr.bf16.mxu1 %v2178_v50  ;;  %v1680_v50 = vcombine.high %v157_v14, %v161_v15  ;;  %v1744_v43 = vcombine.high %v221_v58, %v225_v59  ;;  %v1897_v14 = vld [vmem:[#allocation9 + $0x104] ss:$8 sps:$4 sm:$0xff]  }
 0x127   :  { %1013 = vmatprep.subr.bf16.mxu1 %v1648_v44  ;;  %v229_v44 = vld [vmem:[#allocation7 + $0x398] sm:$0xff]  ;;  %1538 = vmatprep.subr.bf16.mxu0 %v1891_v63 }
 0x128   :  { %v1752_v6 = vcombine.high %v229_v44, %v233_v47  ;;  %v1751_v11 = vcombine.low %v229_v44, %v233_v47 }
 0x12a   :  { %1014 = vmatpush1.bf16.msra.mxu1 %v1647_v3  ;;  %v1889_v3 = vld [vmem:[#allocation9 + $0xe0] ss:$8 sps:$4 sm:$0xff]  }
 0x12b   :  { %1015 = vmatprep.subr.bf16.mxu1 %v1656_v4  ;;  %v1743_v4 = vcombine.low %v221_v58, %v225_v59  ;;  %1539 = vmatpush1.bf16.msra.mxu0 %v1889_v3  ;;  %v1910_v58 = vld [vmem:[#allocation9 + $0x150] ss:$8 sps:$4 sm:$0xff]   ;;  %v1915_v59 = vld [vmem:[#allocation9 + $0x164] ss:$8 sps:$4 sm:$0xff]   ;;  %v1919_v3 = vld [vmem:[#allocation9 + $0x180] ss:$8 sps:$4 sm:$0xff]  }
 0x12e   :  { %1016 = vmatpush1.bf16.msra.mxu1 %v1655_v8  ;;  %v241_v8 = vld [vmem:[#allocation7 + $0x3f8] sm:$0xff] }
 0x12f   :  { %1017 = vmatprep.subr.bf16.mxu1 %v1664_v9  ;;  %v1894_v9 = vld [vmem:[#allocation9 + $0xf4] ss:$8 sps:$4 sm:$0xff]  }
 0x130   :  { %1540 = vmatprep.subr.bf16.mxu0 %v1894_v9  ;;  %v1925_v9 = vld [vmem:[#allocation9 + $0x1a0] ss:$8 sps:$4 sm:$0xff]  }
 0x131   :  { %1541 = vmatpush1.bf16.msra.mxu0 %v1892_v10  ;;  %v1930_v10 = vld [vmem:[#allocation9 + $0x1b4] ss:$8 sps:$4 sm:$0xff]  }
 0x132   :  { %1018 = vmatpush1.bf16.msra.mxu1 %v1663_v12  ;;  %v1760_v12 = vcombine.high %v237_v7, %v241_v8  ;;  %1553 = vmatprep.subr.bf16.mxu0 %v1897_v14  ;;  %v1936_v14 = vld [vmem:[#allocation9 + $0x1d4] ss:$8 sps:$4 sm:$0xff]  }
 0x133   :  { %1019 = vmatprep.subr.bf16.mxu1 %v1672_v13  ;;  %v1759_v13 = vcombine.low %v237_v7, %v241_v8  ;;  %v1922_v7 = vld [vmem:[#allocation9 + $0x190] ss:$8 sps:$4 sm:$0xff]   ;;  %v1927_v8 = vld [vmem:[#allocation9 + $0x1a4] ss:$8 sps:$4 sm:$0xff]  }
 0x136   :  { %1020 = vmatpush1.bf16.msra.mxu1 %v1671_v16 }
 0x137   :  { %1021 = vmatprep.subr.bf16.mxu1 %v1680_v50 }
 0x13a   :  { %1022 = vmatpush1.bf16.msra.mxu1 %v1679_v19 }
 0x13b   :  { %1023 = vmatprep.subr.bf16.mxu1 %v1688_v20 }
 0x13e   :  { %1024 = vmatpush1.bf16.msra.mxu1 %v1687_v25 }
 0x13f   :  { %1025 = vmatprep.subr.bf16.mxu1 %v1696_v26 }
 0x142   :  { %1026 = vmatpush1.bf16.msra.mxu1 %v1695_v31 }
 0x143   :  { %1027 = vmatprep.subr.bf16.mxu1 %v1704_v32 }
 0x146   :  { %1028 = vmatpush1.bf16.msra.mxu1 %v1703_v37 }
 0x147   :  { %1029 = vmatprep.subr.bf16.mxu1 %v1712_v38 }
 0x14a   :  { %1030 = vmatpush1.bf16.msra.mxu1 %v1711_v45 }
 0x14b   :  { %1031 = vmatprep.subr.bf16.mxu1 %v1720_v46 }
 0x14e   :  { %1032 = vmatpush1.bf16.msra.mxu1 %v1719_v52  ;;  %v1898_v52 = vld [vmem:[#allocation9 + $0x110] ss:$8 sps:$4 sm:$0xff]  }
 0x14f   :  { %1033 = vmatprep.subr.bf16.mxu1 %v1728_v2  ;;  %v1903_v2 = vld [vmem:[#allocation9 + $0x124] ss:$8 sps:$4 sm:$0xff]  }
 0x152   :  { %1034 = vmatpush1.bf16.msra.mxu1 %v1727_v56  ;;  %v1907_v56 = vld [vmem:[#allocation9 + $0x140] ss:$8 sps:$4 sm:$0xff]  }
 0x153   :  { %1035 = vmatprep.subr.bf16.mxu1 %v1736_v57  ;;  %v1912_v57 = vld [vmem:[#allocation9 + $0x154] ss:$8 sps:$4 sm:$0xff]  }
 0x156   :  { %1036 = vmatpush1.bf16.msra.mxu1 %v1735_v62  ;;  %v1916_v62 = vld [vmem:[#allocation9 + $0x170] ss:$8 sps:$4 sm:$0xff]  }
 0x157   :  { %1037 = vmatprep.subr.bf16.mxu1 %v1744_v43  ;;  %v1921_v43 = vld [vmem:[#allocation9 + $0x184] ss:$8 sps:$4 sm:$0xff]  }
 0x15a   :  { %1038 = vmatpush1.bf16.msra.mxu1 %v1743_v4 }
 0x15b   :  { %1039 = vmatprep.subr.bf16.mxu1 %v1752_v6  ;;  %v1924_v6 = vld [vmem:[#allocation9 + $0x194] ss:$8 sps:$4 sm:$0xff]  }
 0x15e   :  { %1040 = vmatpush1.bf16.msra.mxu1 %v1751_v11  ;;  %v1928_v11 = vld [vmem:[#allocation9 + $0x1b0] ss:$8 sps:$4 sm:$0xff]  }
 0x15f   :  { %1041 = vmatprep.subr.bf16.mxu1 %v1760_v12  ;;  %v1933_v12 = vld [vmem:[#allocation9 + $0x1c4] ss:$8 sps:$4 sm:$0xff]  }
 0x162   :  { %1042 = vmatpush1.bf16.msra.mxu1 %v1759_v13  ;;  %v1931_v13 = vld [vmem:[#allocation9 + $0x1c0] ss:$8 sps:$4 sm:$0xff]  }
 0x165   :  { %1044 = vmatmul.mubr.bf16.vlgmr.msra.gmra.mrb[8].mxu1 %v2180_v51 }
 0x1b8   :  { %v916_v15 = vpop.f32.mrb[0].mxu1  ;;  %v1002_v16 = vpop.f32.mrb[0].mxu0 }
 0x1b9   :  { %v1761_v50 = vmul.f32 -1.442695, %v916_v15  ;;  %v918_v17 = vpop.f32.mrb[1].mxu1  ;;  %v1004_v18 = vpop.f32.mrb[1].mxu0 }
 0x1ba   :  { %v1762_v19 = vmul.f32 -1.442695, %v918_v17  ;;  %v920_v20 = vpop.f32.mrb[2].mxu1  ;;  %v1006_v21 = vpop.f32.mrb[2].mxu0 }
 0x1bb   :  { %1947 = vpow2.f32 %v1761_v50  ;;  %v1765_v22 = vmul.f32 -1.442695, %v920_v20  ;;  %v922_v23 = vpop.f32.mrb[3].mxu1  ;;  %v1008_v24 = vpop.f32.mrb[3].mxu0  ;;  %v1937_v50 = vld [vmem:[#allocation9 + $0x1e0] ss:$8 sps:$4 sm:$0xff]  }
 0x1bc   :  { %1949 = vpow2.f32 %v1762_v19  ;;  %v1766_v25 = vmul.f32 -1.442695, %v922_v23 }
 0x1bd   :  { %1951 = vpow2.f32 %v1765_v22 }
 0x1be   :  { %1953 = vpow2.f32 %v1766_v25 }
 0x1c5   :  { %v1948_v26 = vpop.eup %1947 }
 0x1c6   :  { %v1950_v51 = vpop.eup %1949  ;;  %v1078_v27 = vadd.f32 1.0, %v1948_v26 }
 0x1c7   :  { %v1952_v28 = vpop.eup %1951  ;;  %v1079_v29 = vadd.f32 1.0, %v1950_v51 }
 0x1c8   :  { %v1954_v30 = vpop.eup %1953  ;;  %1955 = vrcp.f32 %v1078_v27  ;;  %v1082_v31 = vadd.f32 1.0, %v1952_v28 }
 0x1c9   :  { %1957 = vrcp.f32 %v1079_v29  ;;  %v1083_v32 = vadd.f32 1.0, %v1954_v30 }
 0x1ca   :  { %1959 = vrcp.f32 %v1082_v31 }
 0x1cb   :  { %1961 = vrcp.f32 %v1083_v32 }
 0x1d2   :  { %v1956_v33 = vpop.eup %1955 }
 0x1d3   :  { %v1958_v34 = vpop.eup %1957  ;;  %v1102_v35 = vmul.f32 %v1956_v33, %v916_v15  ;;  %v1934_v15 = vld [vmem:[#allocation9 + $0x1d0] ss:$8 sps:$4 sm:$0xff]  }
 0x1d4   :  { %v1960_v36 = vpop.eup %1959  ;;  %v1103_v37 = vmul.f32 %v1958_v34, %v918_v17  ;;  %v1942_v17 = vld [vmem:[#allocation9 + $0x1f4] ss:$8 sps:$4 sm:$0xff]  }
 0x1d5   :  { %v1962_v38 = vpop.eup %1961  ;;  %v1110_v39 = vmul.f32 %v1102_v35, %v1002_v16  ;;  %v1106_v40 = vmul.f32 %v1960_v36, %v920_v20  ;;  %v1939_v16 = vld [vmem:[#allocation9 + $0x1e4] ss:$8 sps:$4 sm:$0xff]   ;;  %v1940_v20 = vld [vmem:[#allocation9 + $0x1f0] ss:$8 sps:$4 sm:$0xff]  }
 0x1d6   :  { %v1111_v41 = vmul.f32 %v1103_v37, %v1004_v18  ;;  %v1107_v42 = vmul.f32 %v1962_v38, %v922_v23 }
 0x1d7   :  { %v1114_v45 = vmul.f32 %v1106_v40, %v1006_v21 }
 0x1d8   :  { %v1115_v46 = vmul.f32 %v1107_v42, %v1008_v24 }
 0x1d9   :  { %v1118_v48 = vpack.c.bf16 %v1114_v45, %v1110_v39 }
 0x1da   :  { %v1119_v49 = vpack.c.bf16 %v1115_v46, %v1111_v41 }
 0x1dc   :  { %1542 = vmatprep.mubr.bf16.mxu0 %v1119_v49 }
 0x1dd   :  { %1543 = vmatmul.mubr.bf16.vlgmr.msra.gmra.mrb[4].mxu0 %v1118_v48 }
 0x1de   :  { %1554 = vmatpush1.bf16.msra.mxu0 %v1895_v1 }
 0x1df   :  { %1555 = vmatprep.subr.bf16.mxu0 %v1900_v0 }
 0x1e2   :  { %1556 = vmatpush1.bf16.msra.mxu0 %v1898_v52 }
 0x1e3   :  { %1557 = vmatprep.subr.bf16.mxu0 %v1903_v2 }
 0x1e6   :  { %1558 = vmatpush1.bf16.msra.mxu0 %v1901_v5 }
 0x1e7   :  { %1559 = vmatprep.subr.bf16.mxu0 %v1906_v53 }
 0x1ea   :  { %1560 = vmatpush1.bf16.msra.mxu0 %v1904_v54 }
 0x1eb   :  { %1561 = vmatprep.subr.bf16.mxu0 %v1909_v55 }
 0x1ee   :  { %1562 = vmatpush1.bf16.msra.mxu0 %v1907_v56 }
 0x1ef   :  { %1563 = vmatprep.subr.bf16.mxu0 %v1912_v57 }
 0x1f2   :  { %1564 = vmatpush1.bf16.msra.mxu0 %v1910_v58 }
 0x1f3   :  { %1565 = vmatprep.subr.bf16.mxu0 %v1915_v59 }
 0x1f6   :  { %1566 = vmatpush1.bf16.msra.mxu0 %v1913_v60 }
 0x1f7   :  { %1567 = vmatprep.subr.bf16.mxu0 %v1918_v61 }
 0x1f8   :  { %v959_v44 = vpop.f32.mrb[4].mxu1 }
 0x1f9   :  { %v961_v47 = vpop.f32.mrb[5].mxu1  ;;  %v1763_v18 = vmul.f32 -1.442695, %v959_v44 }
 0x1fa   :  { %v963_v63 = vpop.f32.mrb[6].mxu1  ;;  %1568 = vmatpush1.bf16.msra.mxu0 %v1916_v62  ;;  %v1764_v19 = vmul.f32 -1.442695, %v961_v47 }
 0x1fb   :  { %v965_v4 = vpop.f32.mrb[7].mxu1  ;;  %1569 = vmatprep.subr.bf16.mxu0 %v1921_v43  ;;  %v1767_v21 = vmul.f32 -1.442695, %v963_v63  ;;  %1963 = vpow2.f32 %v1763_v18 }
 0x1fc   :  { %v1768_v22 = vmul.f32 -1.442695, %v965_v4  ;;  %1965 = vpow2.f32 %v1764_v19 }
 0x1fd   :  { %1967 = vpow2.f32 %v1767_v21 }
 0x1fe   :  { %1570 = vmatpush1.bf16.msra.mxu0 %v1919_v3  ;;  %1969 = vpow2.f32 %v1768_v22 }
 0x1ff   :  { %1571 = vmatprep.subr.bf16.mxu0 %v1924_v6 }
 0x202   :  { %1572 = vmatpush1.bf16.msra.mxu0 %v1922_v7 }
 0x203   :  { %1573 = vmatprep.subr.bf16.mxu0 %v1927_v8 }
 0x205   :  { %v1964_v23 = vpop.eup %1963 }
 0x206   :  { %1574 = vmatpush1.bf16.msra.mxu0 %v1925_v9  ;;  %v1966_v24 = vpop.eup %1965  ;;  %v1080_v51 = vadd.f32 1.0, %v1964_v23 }
 0x207   :  { %1575 = vmatprep.subr.bf16.mxu0 %v1930_v10  ;;  %v1968_v25 = vpop.eup %1967  ;;  %v1081_v27 = vadd.f32 1.0, %v1966_v24 }
 0x208   :  { %v1970_v26 = vpop.eup %1969  ;;  %v1084_v28 = vadd.f32 1.0, %v1968_v25  ;;  %1971 = vrcp.f32 %v1080_v51 }
 0x209   :  { %v1085_v29 = vadd.f32 1.0, %v1970_v26  ;;  %1973 = vrcp.f32 %v1081_v27 }
 0x20a   :  { %1576 = vmatpush1.bf16.msra.mxu0 %v1928_v11  ;;  %1975 = vrcp.f32 %v1084_v28 }
 0x20b   :  { %1577 = vmatprep.subr.bf16.mxu0 %v1933_v12  ;;  %1977 = vrcp.f32 %v1085_v29 }
 0x20e   :  { %1578 = vmatpush1.bf16.msra.mxu0 %v1931_v13 }
 0x20f   :  { %1579 = vmatprep.subr.bf16.mxu0 %v1936_v14 }
 0x212   :  { %1580 = vmatpush1.bf16.msra.mxu0 %v1934_v15  ;;  %v1972_v30 = vpop.eup %1971 }
 0x213   :  { %1581 = vmatprep.subr.bf16.mxu0 %v1939_v16  ;;  %v1974_v31 = vpop.eup %1973  ;;  %v1104_v34 = vmul.f32 %v1972_v30, %v959_v44 }
 0x214   :  { %v1976_v32 = vpop.eup %1975  ;;  %v1105_v35 = vmul.f32 %v1974_v31, %v961_v47 }
 0x215   :  { %v1978_v33 = vpop.eup %1977  ;;  %v1108_v37 = vmul.f32 %v1976_v32, %v963_v63 }
 0x216   :  { %1582 = vmatpush1.bf16.msra.mxu0 %v1937_v50  ;;  %v1109_v40 = vmul.f32 %v1978_v33, %v965_v4 }
 0x217   :  { %1583 = vmatprep.subr.bf16.mxu0 %v1942_v17 }
 0x21a   :  { %1584 = vmatpush1.bf16.msra.mxu0 %v1940_v20 }
 0x238   :  { %v1045_v36 = vpop.f32.mrb[8].mxu1 }
 0x239   :  { %v1112_v38 = vmul.f32 %v1104_v34, %v1045_v36  ;;  %v1047_v39 = vpop.f32.mrb[9].mxu1 }
 0x23a   :  { %v1113_v41 = vmul.f32 %v1105_v35, %v1047_v39  ;;  %v1049_v42 = vpop.f32.mrb[10].mxu1 }
 0x23b   :  { %v1116_v45 = vmul.f32 %v1108_v37, %v1049_v42  ;;  %v1051_v46 = vpop.f32.mrb[11].mxu1 }
 0x23c   :  { %v1117_v48 = vmul.f32 %v1109_v40, %v1051_v46 }
 0x23d   :  { %v1120_v49 = vpack.c.bf16 %v1116_v45, %v1112_v38 }
 0x23e   :  { %v1121_v1 = vpack.c.bf16 %v1117_v48, %v1113_v41 }
 0x240   :  { %1585 = vmatprep.mubr.bf16.mxu0 %v1121_v1 }
 0x241   :  { %1586 = vmatmul.mubr.bf16.vlgmr.msra.gmra.mrb[4].mxu0 %v1120_v49 }
 0x314   :  { %v1587_v0 = vpop.f32.mrb[4].mxu0 }
 0x315   :  { %1611 = vst [vmem:[#allocation10] sm:$0xff] %v1587_v0  ;;  %v1589_v52 = vpop.f32.mrb[5].mxu0 }
 0x316   :  { %1612 = vst [vmem:[#allocation10 + $0x8] sm:$0xff] %v1589_v52  ;;  %v1591_v2 = vpop.f32.mrb[6].mxu0 }
 0x317   :  { %1613 = vst [vmem:[#allocation10 + $0x10] sm:$0xff] %v1591_v2  ;;  %v1593_v5 = vpop.f32.mrb[7].mxu0 }
 0x318   :  { %1614 = vst [vmem:[#allocation10 + $0x18] sm:$0xff] %v1593_v5 }
 0x319   :  { %2056 = shalt.err (!%p2053_p0)
}
 0x31a   :  { %s2057_s8 = scalar_lea.hbm %s2212_s4, 512 }
 0x31b   :  { %p2058_p1 = scmp.ne.s32.totalorder %s2212_s4, %s2057_s8  ;;  %p2061_p2 = scmp.lt.u32.totalorder %s2057_s8, %s2212_s4 }
 0x31d   :  { %p2063_p3 = pnand %p2061_p2, %p2058_p1 }
 0x31f   :  { %2066 = shalt.err (!%p2063_p3)
}
 0x320   :  { %1626 = dma.vmem_to_hbm [thread:$0]  %s1621_s30, 512, %s2212_s4, [#allocation6], %s2077_s2, %s2077_s2, %s2078_s13  }
 0x321   :  { %2071 = dma.done.wait [#allocation6], 512  }
 0x322   :  { %2072 = vsyncadd [#allocation6], 4294966784 }
 0x323   :  { %1630 = vsyncpa [#allocation5], 1 }
 0x324   :  { %1631 = vsyncpa [#allocation8], 1 }
 0x325   :  { %1632 = vsyncpa [#allocation6], 1 }

</bundles_post_ra>
